<compile_context>
chip_gen: v7x
topology: tpu7x:2x2x1
jax: 0.10.0
libtpu: 0.0.40
codegen_flags: <defaults>
</compile_context>

<pallas_src>
import math
import functools

import jax
import jax.numpy as jnp
from jax import lax
from jax.experimental import pallas as pl
from jax.experimental.pallas import tpu as pltpu


_LANES = 128  # vreg lane width; m/l scratch is kept lane-dense


# ----------------------------------------------------------------------------
# Kernel 1a: head-major QKV projection, three matmuls (used when dh % 128 != 0)
# ----------------------------------------------------------------------------
def _qkv_proj_kernel_split(x_ref, wq_ref, wk_ref, wv_ref, bq_ref, bk_ref, bv_ref,
                           q_ref, k_ref, v_ref, *, scale):
    x = x_ref[...]                                            # (ts, D), native dtype
    q = jnp.dot(x, wq_ref[...], preferred_element_type=jnp.float32) \
        + bq_ref[...].astype(jnp.float32)
    q_ref[...] = (q * scale).astype(q_ref.dtype)              # fold softmax scale
    k = jnp.dot(x, wk_ref[...], preferred_element_type=jnp.float32) \
        + bk_ref[...].astype(jnp.float32)
    k_ref[...] = k.astype(k_ref.dtype)
    v = jnp.dot(x, wv_ref[...], preferred_element_type=jnp.float32) \
        + bv_ref[...].astype(jnp.float32)
    v_ref[...] = v.astype(v_ref.dtype)


# ----------------------------------------------------------------------------
# Kernel 1b: fused QKV, one (ts,D)@(D,3*dh) matmul (used when dh % 128 == 0,
# so the q/k/v splits are lane-aligned and free)
# ----------------------------------------------------------------------------
def _qkv_proj_kernel_fused(x_ref, w_ref, b_ref, q_ref, k_ref, v_ref, *, scale, dh):
    x = x_ref[...]                                            # (ts, D)
    y = jnp.dot(x, w_ref[...], preferred_element_type=jnp.float32) \
        + b_ref[...].astype(jnp.float32)                      # (ts, 3*dh)
    q_ref[...] = (y[:, :dh] * scale).astype(q_ref.dtype)
    k_ref[...] = y[:, dh:2 * dh].astype(k_ref.dtype)
    v_ref[...] = y[:, 2 * dh:].astype(v_ref.dtype)


# ----------------------------------------------------------------------------
# Kernel 2: flash attention (online softmax over KV tiles) + fused out-proj
# ----------------------------------------------------------------------------
def _flash_attn_out_kernel(q_ref, k_ref, v_ref, wo_ref, bo_ref, o_ref,
                           m_sc, l_sc, acc_sc, oacc_sc, *,
                           causal, tq, tk, exp_dtype, approx_recip):
    h = pl.program_id(2)
    ki = pl.program_id(3)
    nh = pl.num_programs(2)
    nk = pl.num_programs(3)

    @pl.when(ki == 0)
    def _():                                                  # per-head flash init
        m_sc[...] = jnp.full(m_sc.shape, -jnp.inf, m_sc.dtype)
        l_sc[...] = jnp.zeros(l_sc.shape, l_sc.dtype)
        acc_sc[...] = jnp.zeros(acc_sc.shape, acc_sc.dtype)

    @pl.when(jnp.logical_and(h == 0, ki == 0))
    def _():                                                  # per-(b, q-tile) init
        oacc_sc[...] = jnp.zeros(oacc_sc.shape, oacc_sc.dtype)

    def _attend():
        q = q_ref[...]                                        # (tq, dh), pre-scaled
        k = k_ref[...]                                        # (tk, dh)
        v = v_ref[...]                                        # (tk, dh)
        # scores = q @ k^T, contracting the head dim of both (no explicit .T)
        s = lax.dot_general(q, k, (((1,), (1,)), ((), ())),
                            preferred_element_type=jnp.float32)   # (tq, tk)
        if causal:
            qi = pl.program_id(1)
            # single constant (col - row) diff matrix vs. a scalar tile offset
            diff = (lax.broadcasted_iota(jnp.int32, (tq, tk), 1)
                    - lax.broadcasted_iota(jnp.int32, (tq, tk), 0))
            s = jnp.where(diff > qi * tq - ki * tk, -1e30, s)

        m_prev = m_sc[...]                                    # (tq, 128), lanes equal
        l_prev = l_sc[...]                                    # (tq, 128)
        m_cur = jnp.max(s, axis=-1, keepdims=True)            # (tq, 1)
        m_next = jnp.maximum(m_prev, m_cur)                   # (tq, 128)
        alpha = jnp.exp((m_prev - m_next).astype(exp_dtype)).astype(jnp.float32)
        p = jnp.exp((s - m_next[:, :1]).astype(exp_dtype))    # (tq, tk)
        l_sc[...] = alpha * l_prev + jnp.sum(p.astype(jnp.float32),
                                             axis=-1, keepdims=True)
        acc_sc[...] = alpha[:, :1] * acc_sc[...] + jnp.dot(
            p.astype(v.dtype), v, preferred_element_type=jnp.float32)
        m_sc[...] = m_next

    if causal:
        qi = pl.program_id(1)

        @pl.when(ki * tk <= qi * tq + (tq - 1))               # skip fully-masked tiles
        def _():
            _attend()
    else:
        _attend()

    @pl.when(ki == nk - 1)
    def _():
        # Finalize this head and fold its out-projection slice into the
        # (tq, D) output accumulator (summed over heads).
        l = l_sc[...]
        if approx_recip:
            inv = pl.reciprocal(l, approx=True)
        else:
            inv = 1.0 / l
        o_h = acc_sc[...] * inv[:, :1]                                # (tq, dh)
        oacc_sc[...] += jnp.dot(o_h.astype(wo_ref.dtype), wo_ref[...],
                                preferred_element_type=jnp.float32)   # (tq, D)

    @pl.when(jnp.logical_and(ki == nk - 1, h == nh - 1))
    def _():
        o_ref[...] = (oacc_sc[...]
                      + bo_ref[...].astype(jnp.float32)).astype(o_ref.dtype)


# ----------------------------------------------------------------------------
# Wrapper helpers
# ----------------------------------------------------------------------------
def _pick_tile(n, target):
    """Largest divisor of n that is <= target (>= 1)."""
    t = max(1, min(n, target))
    while n % t:
        t -= 1
    return t


def _vmem_capacity_bytes():
    try:
        return int(pltpu.get_tpu_info().vmem_capacity_bytes)
    except Exception:
        return 64 * 1024 * 1024       # safe lower bound (v7x per-core VMEM)


def _proj_working_set(ts, D, dh, isz):
    # double-buffered DMA blocks + f32 in-kernel temporaries + Mosaic allowance
    dma = (2 * ts * D + 2 * 3 * D * dh + 2 * 3 * dh + 3 * 2 * ts * dh) * isz
    temps = 4 * ts * 3 * dh * 4
    return dma + temps + (6 << 20)


def _attn_working_set(tq, tk, dh, D, isz, kv_buffers=2):
    dma = (2 * tq * dh + 2 * kv_buffers * tk * dh + 2 * dh * D
           + 2 * D + 2 * tq * D) * isz
    scratch = (2 * tq * _LANES + tq * dh + tq * D) * 4
    temps = 3 * tq * tk * 4                     # s / p f32 temporaries
    return dma + scratch + temps + (6 << 20)    # + Mosaic internal allowance


def self_attention(x, w_in, b_in, w_out, b_out, *, n_heads, causal_mask=False,
                   seq_tile=512, q_tile=512, kv_tile=512, kv_buffers=2):
    """Multi-head self-attention with fused in/out projections.

    x: (B, S, D). Weights are in PyTorch nn.Linear layout:
      w_in: (3D, D), b_in: (3D,), w_out: (D, D), b_out: (D,)   (y = x @ W.T + b)
    """
    B, S, D = x.shape
    assert D % n_heads == 0
    dh = D // n_heads
    scale = 1.0 / math.sqrt(dh)
    dtype = x.dtype
    isz = jnp.dtype(dtype).itemsize

    # Generation-aware VMEM budget: physical capacity minus headroom.
    vmem_cap = _vmem_capacity_bytes()
    vmem_limit = int(max(32 << 20, vmem_cap - (16 << 20)))

    # Cheap exp / approx reciprocal only when the model dtype is bf16.
    exp_dtype = jnp.bfloat16 if dtype == jnp.bfloat16 else jnp.float32
    approx_recip = (dtype == jnp.bfloat16)

    # --- host-side weight layout plumbing (one-time, tiny) -------------------
    w_in_t = w_in.T                                           # (D, 3D)
    w_q, w_k, w_v = jnp.split(w_in_t, 3, axis=1)              # each (D, D)
    b_q, b_k, b_v = jnp.split(b_in, 3)                        # each (D,)

    def headify_w(w):                                         # (D, D) -> (H, D, dh)
        return w.reshape(D, n_heads, dh).transpose(1, 0, 2).astype(dtype)

    def headify_b(b):                                         # (D,) -> (H, 1, dh)
        return b.reshape(n_heads, 1, dh).astype(dtype)

    wq_h, wk_h, wv_h = headify_w(w_q), headify_w(w_k), headify_w(w_v)
    bq_h, bk_h, bv_h = headify_b(b_q), headify_b(b_k), headify_b(b_v)
    w_out_h = w_out.T.reshape(n_heads, dh, D).astype(dtype)   # (H, dh, D)
    b_out_2d = b_out.reshape(1, D).astype(dtype)              # (1, D)

    # --- tile selection (VMEM- and megacore-aware) ----------------------------
    ts = _pick_tile(S, seq_tile)
    while _proj_working_set(ts, D, dh, isz) > vmem_limit and ts > 8:
        new = _pick_tile(S, ts // 2)
        if new >= ts:
            break
        ts = new

    tq = _pick_tile(S, q_tile)
    tk = _pick_tile(S, kv_tile)
    while _attn_working_set(tq, tk, dh, D, isz, kv_buffers) > vmem_limit and tq > 8:
        new = _pick_tile(S, tq // 2)
        if new >= tq:
            break
        tq = new
    while _attn_working_set(tq, tk, dh, D, isz, kv_buffers) > vmem_limit and tk > 8:
        new = _pick_tile(S, tk // 2)
        if new >= tk:
            break
        tk = new
    # Megacore occupancy (v7x): keep >= 4 parallel (b, q-tile) blocks if we can.
    while B * (S // tq) < 4 and tq > 128:
        new = _pick_tile(S, tq // 2)
        if new >= tq:
            break
        tq = new

    # --- Kernel 1: QKV projection into head-major (B, H, S, dh) ---------------
    qkv_shape = jax.ShapeDtypeStruct((B, n_heads, S, dh), dtype)
    x_spec = pl.BlockSpec((None, ts, D), lambda b, si, h: (b, si, 0))
    qkv_out_specs = [
        pl.BlockSpec((None, None, ts, dh), lambda b, si, h: (b, h, si, 0)),
        pl.BlockSpec((None, None, ts, dh), lambda b, si, h: (b, h, si, 0)),
        pl.BlockSpec((None, None, ts, dh), lambda b, si, h: (b, h, si, 0)),
    ]
    proj_params = pltpu.CompilerParams(
        dimension_semantics=("parallel", "parallel", "parallel"),
        vmem_limit_bytes=vmem_limit)

    if dh % 128 == 0:
        # Fused Wq|Wk|Wv -> one wide matmul per head; lane-aligned output splits.
        w_fused = jnp.concatenate([wq_h, wk_h, wv_h], axis=-1)     # (H, D, 3*dh)
        b_fused = jnp.concatenate([bq_h, bk_h, bv_h], axis=-1)     # (H, 1, 3*dh)
        q, k, v = pl.pallas_call(
            functools.partial(_qkv_proj_kernel_fused, scale=scale, dh=dh),
            out_shape=(qkv_shape, qkv_shape, qkv_shape),
            grid_spec=pltpu.PrefetchScalarGridSpec(
                num_scalar_prefetch=0,
                grid=(B, S // ts, n_heads),
                in_specs=[
                    x_spec,
                    pl.BlockSpec((None, D, 3 * dh), lambda b, si, h: (h, 0, 0)),
                    pl.BlockSpec((None, 1, 3 * dh), lambda b, si, h: (h, 0, 0)),
                ],
                out_specs=qkv_out_specs,
            ),
            compiler_params=proj_params,
        )(x, w_fused, b_fused)
    else:
        # dh < 128: keep three matmuls (fused splits would cross lane boundaries).
        q, k, v = pl.pallas_call(
            functools.partial(_qkv_proj_kernel_split, scale=scale),
            out_shape=(qkv_shape, qkv_shape, qkv_shape),
            grid_spec=pltpu.PrefetchScalarGridSpec(
                num_scalar_prefetch=0,
                grid=(B, S // ts, n_heads),
                in_specs=[
                    x_spec,
                    pl.BlockSpec((None, D, dh), lambda b, si, h: (h, 0, 0)),
                    pl.BlockSpec((None, D, dh), lambda b, si, h: (h, 0, 0)),
                    pl.BlockSpec((None, D, dh), lambda b, si, h: (h, 0, 0)),
                    pl.BlockSpec((None, 1, dh), lambda b, si, h: (h, 0, 0)),
                    pl.BlockSpec((None, 1, dh), lambda b, si, h: (h, 0, 0)),
                    pl.BlockSpec((None, 1, dh), lambda b, si, h: (h, 0, 0)),
                ],
                out_specs=qkv_out_specs,
            ),
            compiler_params=proj_params,
        )(x, wq_h, wk_h, wv_h, bq_h, bk_h, bv_h)

    # --- Kernel 2: flash attention + fused output projection ------------------
    if kv_buffers > 2:
        # Optional deeper K/V pipelining (useful on v5e if K/V DMA is exposed).
        k_spec = pl.BlockSpec((None, None, tk, dh), lambda b, qi, h, ki: (b, h, ki, 0),
                              pipeline_mode=pl.Buffered(kv_buffers))
        v_spec = pl.BlockSpec((None, None, tk, dh), lambda b, qi, h, ki: (b, h, ki, 0),
                              pipeline_mode=pl.Buffered(kv_buffers))
    else:
        k_spec = pl.BlockSpec((None, None, tk, dh), lambda b, qi, h, ki: (b, h, ki, 0))
        v_spec = pl.BlockSpec((None, None, tk, dh), lambda b, qi, h, ki: (b, h, ki, 0))

    out = pl.pallas_call(
        functools.partial(_flash_attn_out_kernel,
                          causal=causal_mask, tq=tq, tk=tk,
                          exp_dtype=exp_dtype, approx_recip=approx_recip),
        out_shape=jax.ShapeDtypeStruct((B, S, D), dtype),
        grid_spec=pltpu.PrefetchScalarGridSpec(
            num_scalar_prefetch=0,
            grid=(B, S // tq, n_heads, S // tk),
            in_specs=[
                pl.BlockSpec((None, None, tq, dh),
                             lambda b, qi, h, ki: (b, h, qi, 0)),           # q
                k_spec,                                                     # k
                v_spec,                                                     # v
                pl.BlockSpec((None, dh, D),
                             lambda b, qi, h, ki: (h, 0, 0)),               # Wout[h]
                pl.BlockSpec((1, D), lambda b, qi, h, ki: (0, 0)),          # b_out
            ],
            out_specs=pl.BlockSpec((None, tq, D),
                                   lambda b, qi, h, ki: (b, qi, 0)),
            scratch_shapes=[
                pltpu.VMEM((tq, _LANES), jnp.float32),   # m (running max, lane-dense)
                pltpu.VMEM((tq, _LANES), jnp.float32),   # l (running denom, lane-dense)
                pltpu.VMEM((tq, dh), jnp.float32),       # per-head accumulator
                pltpu.VMEM((tq, D), jnp.float32),        # out-proj accumulator
            ],
        ),
        compiler_params=pltpu.CompilerParams(
            dimension_semantics=("parallel", "parallel", "arbitrary", "arbitrary"),
            vmem_limit_bytes=vmem_limit),
    )(q, k, v, w_out_h, b_out_2d)
    return out


# ----------------------------------------------------------------------------
# Pure-JAX reference (matches the PyTorch forward; causal_mask=False path)
# ----------------------------------------------------------------------------
def _reference(x, w_in, b_in, w_out, b_out, *, n_heads):
    B, S, D = x.shape
    dh = D // n_heads
    qkv = x @ w_in.T + b_in
    q, k, v = jnp.split(qkv, 3, axis=-1)

    def heads(t):
        return t.reshape(B, S, n_heads, dh).transpose(0, 2, 1, 3)

    q, k, v = heads(q), heads(k), heads(v)
    w = jnp.einsum("bhqd,bhkd->bhqk", q, k) / math.sqrt(dh)
    w = jax.nn.softmax(w, axis=-1)
    o = jnp.einsum("bhqk,bhkd->bhqd", w, v)
    o = o.transpose(0, 2, 1, 3).reshape(B, S, D)
    return o @ w_out.T + b_out


if __name__ == "__main__":
    # Small shapes consistent with the module: batch=2, seq=8, d_embed=32, heads=4
    B, S, D, H = 2, 8, 32, 4

    key = jax.random.PRNGKey(0)
    kx, kwi, kbi, kwo, kbo = jax.random.split(key, 5)

    x = jax.random.normal(kx, (B, S, D), dtype=jnp.float32)

    bound = 1.0 / math.sqrt(D)
    w_in = jax.random.uniform(kwi, (3 * D, D), jnp.float32, -bound, bound)
    b_in = jax.random.uniform(kbi, (3 * D,), jnp.float32, -bound, bound)
    w_out = jax.random.uniform(kwo, (D, D), jnp.float32, -bound, bound)
    b_out = jax.random.uniform(kbo, (D,), jnp.float32, -bound, bound)

    # TODO(synk): the PyTorch causal branch calls masked_fill non-in-place and
    # discards the result, so causal_mask is effectively a no-op there; a real
    # causal path (with pl.when KV-tile skipping) is implemented but off here.
    fn = jax.jit(functools.partial(self_attention, n_heads=H, causal_mask=False))
    out = jax.block_until_ready(fn(x, w_in, b_in, w_out, b_out))

    ref = _reference(x, w_in, b_in, w_out, b_out, n_heads=H)
    assert out.shape == (B, S, D)
    assert jnp.allclose(out, ref, atol=2e-3, rtol=2e-3), "mismatch vs reference"

    print("KERNEL_OK")
</pallas_src>

<mosaic_0001>
module attributes {stable_mosaic.version = 11 : i64} {
  func.func @_qkv_proj_kernel_split(%arg0: i32, %arg1: i32, %arg2: i32, %arg3: memref<1x8x32xf32, #tpu.memory_space<vmem>>, %arg4: memref<1x32x8xf32, #tpu.memory_space<vmem>>, %arg5: memref<1x32x8xf32, #tpu.memory_space<vmem>>, %arg6: memref<1x32x8xf32, #tpu.memory_space<vmem>>, %arg7: memref<1x1x8xf32, #tpu.memory_space<vmem>>, %arg8: memref<1x1x8xf32, #tpu.memory_space<vmem>>, %arg9: memref<1x1x8xf32, #tpu.memory_space<vmem>>, %arg10: memref<1x1x8x8xf32, #tpu.memory_space<vmem>>, %arg11: memref<1x1x8x8xf32, #tpu.memory_space<vmem>>, %arg12: memref<1x1x8x8xf32, #tpu.memory_space<vmem>>) attributes {dimension_semantics = [#tpu.dimension_semantics<parallel>, #tpu.dimension_semantics<parallel>, #tpu.dimension_semantics<parallel>], iteration_bounds = array<i64: 2, 1, 4>, scalar_prefetch = 0 : i64, scratch_operands = 0 : i64, tpu.core_type = #tpu.core_type<tc>, window_params = [{transform_indices = @transform_0, window_bounds = array<i64: 1, 8, 32>}, {transform_indices = @transform_1, window_bounds = array<i64: 1, 32, 8>}, {transform_indices = @transform_2, window_bounds = array<i64: 1, 32, 8>}, {transform_indices = @transform_3, window_bounds = array<i64: 1, 32, 8>}, {transform_indices = @transform_4, window_bounds = array<i64: 1, 1, 8>}, {transform_indices = @transform_5, window_bounds = array<i64: 1, 1, 8>}, {transform_indices = @transform_6, window_bounds = array<i64: 1, 1, 8>}, {transform_indices = @transform_7, window_bounds = array<i64: 1, 1, 8, 8>}, {transform_indices = @transform_8, window_bounds = array<i64: 1, 1, 8, 8>}, {transform_indices = @transform_9, window_bounds = array<i64: 1, 1, 8, 8>}]} {
    %c0 = arith.constant 0 : index
    %c0_0 = arith.constant 0 : index
    %c0_1 = arith.constant 0 : index
    %0 = vector.load %arg3[%c0, %c0_0, %c0_1] : memref<1x8x32xf32, #tpu.memory_space<vmem>>, vector<1x8x32xf32>
    %1 = vector.shape_cast %0 : vector<1x8x32xf32> to vector<8x32xf32>
    %c0_2 = arith.constant 0 : index
    %c0_3 = arith.constant 0 : index
    %c0_4 = arith.constant 0 : index
    %2 = vector.load %arg4[%c0_2, %c0_3, %c0_4] : memref<1x32x8xf32, #tpu.memory_space<vmem>>, vector<1x32x8xf32>
    %3 = vector.shape_cast %2 : vector<1x32x8xf32> to vector<32x8xf32>
    %cst = arith.constant dense<0.000000e+00> : vector<8x8xf32>
    %4 = tpu.matmul %1, %3, %cst {dimension_numbers = #tpu.dot_dimension_numbers<[1], [0], [0], [1], [0, 0, 1, 1], [], []>} : vector<8x32xf32>, vector<32x8xf32>, vector<8x8xf32> -> vector<8x8xf32>
    %c0_5 = arith.constant 0 : index
    %c0_6 = arith.constant 0 : index
    %c0_7 = arith.constant 0 : index
    %5 = vector.load %arg7[%c0_5, %c0_6, %c0_7] : memref<1x1x8xf32, #tpu.memory_space<vmem>>, vector<1x1x8xf32>
    %6 = vector.shape_cast %5 : vector<1x1x8xf32> to vector<1x8xf32>
    %7 = vector.broadcast %6 : vector<1x8xf32> to vector<8x8xf32>
    %8 = arith.addf %4, %7 : vector<8x8xf32>
    %cst_8 = arith.constant 0.353553385 : f32
    %9 = vector.broadcast %cst_8 : f32 to vector<8x8xf32>
    %10 = arith.mulf %8, %9 : vector<8x8xf32>
    %c0_9 = arith.constant 0 : index
    %c0_10 = arith.constant 0 : index
    %c0_11 = arith.constant 0 : index
    %c0_12 = arith.constant 0 : index
    %11 = vector.load %arg10[%c0_9, %c0_10, %c0_11, %c0_12] : memref<1x1x8x8xf32, #tpu.memory_space<vmem>>, vector<1x1x8x8xf32>
    %12 = vector.shape_cast %11 : vector<1x1x8x8xf32> to vector<8x8xf32>
    %13 = vector.shape_cast %10 : vector<8x8xf32> to vector<1x1x8x8xf32>
    tpu.vector_store %arg10[%c0_9, %c0_10, %c0_11, %c0_12], %13 {strides = array<i32>} : memref<1x1x8x8xf32, #tpu.memory_space<vmem>>, vector<1x1x8x8xf32>,
    %c0_13 = arith.constant 0 : index
    %c0_14 = arith.constant 0 : index
    %c0_15 = arith.constant 0 : index
    %14 = vector.load %arg5[%c0_13, %c0_14, %c0_15] : memref<1x32x8xf32, #tpu.memory_space<vmem>>, vector<1x32x8xf32>
    %15 = vector.shape_cast %14 : vector<1x32x8xf32> to vector<32x8xf32>
    %cst_16 = arith.constant dense<0.000000e+00> : vector<8x8xf32>
    %16 = tpu.matmul %1, %15, %cst_16 {dimension_numbers = #tpu.dot_dimension_numbers<[1], [0], [0], [1], [0, 0, 1, 1], [], []>} : vector<8x32xf32>, vector<32x8xf32>, vector<8x8xf32> -> vector<8x8xf32>
    %c0_17 = arith.constant 0 : index
    %c0_18 = arith.constant 0 : index
    %c0_19 = arith.constant 0 : index
    %17 = vector.load %arg8[%c0_17, %c0_18, %c0_19] : memref<1x1x8xf32, #tpu.memory_space<vmem>>, vector<1x1x8xf32>
    %18 = vector.shape_cast %17 : vector<1x1x8xf32> to vector<1x8xf32>
    %19 = vector.broadcast %18 : vector<1x8xf32> to vector<8x8xf32>
    %20 = arith.addf %16, %19 : vector<8x8xf32>
    %c0_20 = arith.constant 0 : index
    %c0_21 = arith.constant 0 : index
    %c0_22 = arith.constant 0 : index
    %c0_23 = arith.constant 0 : index
    %21 = vector.load %arg11[%c0_20, %c0_21, %c0_22, %c0_23] : memref<1x1x8x8xf32, #tpu.memory_space<vmem>>, vector<1x1x8x8xf32>
    %22 = vector.shape_cast %21 : vector<1x1x8x8xf32> to vector<8x8xf32>
    %23 = vector.shape_cast %20 : vector<8x8xf32> to vector<1x1x8x8xf32>
    tpu.vector_store %arg11[%c0_20, %c0_21, %c0_22, %c0_23], %23 {strides = array<i32>} : memref<1x1x8x8xf32, #tpu.memory_space<vmem>>, vector<1x1x8x8xf32>,
    %c0_24 = arith.constant 0 : index
    %c0_25 = arith.constant 0 : index
    %c0_26 = arith.constant 0 : index
    %24 = vector.load %arg6[%c0_24, %c0_25, %c0_26] : memref<1x32x8xf32, #tpu.memory_space<vmem>>, vector<1x32x8xf32>
    %25 = vector.shape_cast %24 : vector<1x32x8xf32> to vector<32x8xf32>
    %cst_27 = arith.constant dense<0.000000e+00> : vector<8x8xf32>
    %26 = tpu.matmul %1, %25, %cst_27 {dimension_numbers = #tpu.dot_dimension_numbers<[1], [0], [0], [1], [0, 0, 1, 1], [], []>} : vector<8x32xf32>, vector<32x8xf32>, vector<8x8xf32> -> vector<8x8xf32>
    %c0_28 = arith.constant 0 : index
    %c0_29 = arith.constant 0 : index
    %c0_30 = arith.constant 0 : index
    %27 = vector.load %arg9[%c0_28, %c0_29, %c0_30] : memref<1x1x8xf32, #tpu.memory_space<vmem>>, vector<1x1x8xf32>
    %28 = vector.shape_cast %27 : vector<1x1x8xf32> to vector<1x8xf32>
    %29 = vector.broadcast %28 : vector<1x8xf32> to vector<8x8xf32>
    %30 = arith.addf %26, %29 : vector<8x8xf32>
    %c0_31 = arith.constant 0 : index
    %c0_32 = arith.constant 0 : index
    %c0_33 = arith.constant 0 : index
    %c0_34 = arith.constant 0 : index
    %31 = vector.load %arg12[%c0_31, %c0_32, %c0_33, %c0_34] : memref<1x1x8x8xf32, #tpu.memory_space<vmem>>, vector<1x1x8x8xf32>
    %32 = vector.shape_cast %31 : vector<1x1x8x8xf32> to vector<8x8xf32>
    %33 = vector.shape_cast %30 : vector<8x8xf32> to vector<1x1x8x8xf32>
    tpu.vector_store %arg12[%c0_31, %c0_32, %c0_33, %c0_34], %33 {strides = array<i32>} : memref<1x1x8x8xf32, #tpu.memory_space<vmem>>, vector<1x1x8x8xf32>,
    return
  }
  func.func @transform_0(%arg0: i32, %arg1: i32, %arg2: i32) -> (i32, i32, i32) {
    %c0_i32 = arith.constant 0 : i32
    %c0_i32_0 = arith.constant 0 : i32
    return %arg0, %arg1, %c0_i32 : i32, i32, i32
  }
  func.func @transform_1(%arg0: i32, %arg1: i32, %arg2: i32) -> (i32, i32, i32) {
    %c0_i32 = arith.constant 0 : i32
    %c0_i32_0 = arith.constant 0 : i32
    %c0_i32_1 = arith.constant 0 : i32
    return %arg2, %c0_i32, %c0_i32_0 : i32, i32, i32
  }
  func.func @transform_2(%arg0: i32, %arg1: i32, %arg2: i32) -> (i32, i32, i32) {
    %c0_i32 = arith.constant 0 : i32
    %c0_i32_0 = arith.constant 0 : i32
    %c0_i32_1 = arith.constant 0 : i32
    return %arg2, %c0_i32, %c0_i32_0 : i32, i32, i32
  }
  func.func @transform_3(%arg0: i32, %arg1: i32, %arg2: i32) -> (i32, i32, i32) {
    %c0_i32 = arith.constant 0 : i32
    %c0_i32_0 = arith.constant 0 : i32
    %c0_i32_1 = arith.constant 0 : i32
    return %arg2, %c0_i32, %c0_i32_0 : i32, i32, i32
  }
  func.func @transform_4(%arg0: i32, %arg1: i32, %arg2: i32) -> (i32, i32, i32) {
    %c0_i32 = arith.constant 0 : i32
    %c0_i32_0 = arith.constant 0 : i32
    %c0_i32_1 = arith.constant 0 : i32
    return %arg2, %c0_i32, %c0_i32_0 : i32, i32, i32
  }
  func.func @transform_5(%arg0: i32, %arg1: i32, %arg2: i32) -> (i32, i32, i32) {
    %c0_i32 = arith.constant 0 : i32
    %c0_i32_0 = arith.constant 0 : i32
    %c0_i32_1 = arith.constant 0 : i32
    return %arg2, %c0_i32, %c0_i32_0 : i32, i32, i32
  }
  func.func @transform_6(%arg0: i32, %arg1: i32, %arg2: i32) -> (i32, i32, i32) {
    %c0_i32 = arith.constant 0 : i32
    %c0_i32_0 = arith.constant 0 : i32
    %c0_i32_1 = arith.constant 0 : i32
    return %arg2, %c0_i32, %c0_i32_0 : i32, i32, i32
  }
  func.func @transform_7(%arg0: i32, %arg1: i32, %arg2: i32) -> (i32, i32, i32, i32) {
    %c0_i32 = arith.constant 0 : i32
    %c0_i32_0 = arith.constant 0 : i32
    return %arg0, %arg2, %arg1, %c0_i32 : i32, i32, i32, i32
  }
  func.func @transform_8(%arg0: i32, %arg1: i32, %arg2: i32) -> (i32, i32, i32, i32) {
    %c0_i32 = arith.constant 0 : i32
    %c0_i32_0 = arith.constant 0 : i32
    return %arg0, %arg2, %arg1, %c0_i32 : i32, i32, i32, i32
  }
  func.func @transform_9(%arg0: i32, %arg1: i32, %arg2: i32) -> (i32, i32, i32, i32) {
    %c0_i32 = arith.constant 0 : i32
    %c0_i32_0 = arith.constant 0 : i32
    return %arg0, %arg2, %arg1, %c0_i32 : i32, i32, i32, i32
  }
}

module attributes {stable_mosaic.version = 11 : i64} {
  func.func @_flash_attn_out_kernel(%arg0: i32, %arg1: i32, %arg2: i32, %arg3: i32, %arg4: memref<1x1x8x8xf32, #tpu.memory_space<vmem>>, %arg5: memref<1x1x8x8xf32, #tpu.memory_space<vmem>>, %arg6: memref<1x1x8x8xf32, #tpu.memory_space<vmem>>, %arg7: memref<1x8x32xf32, #tpu.memory_space<vmem>>, %arg8: memref<1x32xf32, #tpu.memory_space<vmem>>, %arg9: memref<1x8x32xf32, #tpu.memory_space<vmem>>, %arg10: memref<8x128xf32, #tpu.memory_space<vmem>>, %arg11: memref<8x128xf32, #tpu.memory_space<vmem>>, %arg12: memref<8x8xf32, #tpu.memory_space<vmem>>, %arg13: memref<8x32xf32, #tpu.memory_space<vmem>>) attributes {dimension_semantics = [#tpu.dimension_semantics<parallel>, #tpu.dimension_semantics<parallel>, #tpu.dimension_semantics<arbitrary>, #tpu.dimension_semantics<arbitrary>], iteration_bounds = array<i64: 2, 1, 4, 1>, scalar_prefetch = 0 : i64, scratch_operands = 4 : i64, tpu.core_type = #tpu.core_type<tc>, window_params = [{transform_indices = @transform_0, window_bounds = array<i64: 1, 1, 8, 8>}, {transform_indices = @transform_1, window_bounds = array<i64: 1, 1, 8, 8>}, {transform_indices = @transform_2, window_bounds = array<i64: 1, 1, 8, 8>}, {transform_indices = @transform_3, window_bounds = array<i64: 1, 8, 32>}, {pipeline_mode = #tpu.pipeline_mode<synchronous>, transform_indices = @transform_4, window_bounds = array<i64: 1, 32>}, {transform_indices = @transform_5, window_bounds = array<i64: 1, 8, 32>}]} {
    %c0_i32 = arith.constant 0 : i32
    %0 = arith.cmpi eq, %arg3, %c0_i32 : i32
    %1 = arith.extui %0 : i1 to i32
    %c0_i32_0 = arith.constant 0 : i32
    %2 = arith.cmpi ne, %1, %c0_i32_0 : i32
    scf.if %2 {
      %cst_34 = arith.constant 0xFF800000 : f32
      %49 = vector.broadcast %cst_34 : f32 to vector<8x128xf32>
      %c0_35 = arith.constant 0 : index
      %c0_36 = arith.constant 0 : index
      %50 = vector.load %arg10[%c0_35, %c0_36] : memref<8x128xf32, #tpu.memory_space<vmem>>, vector<8x128xf32>
      tpu.vector_store %arg10[%c0_35, %c0_36], %49 {strides = array<i32>} : memref<8x128xf32, #tpu.memory_space<vmem>>, vector<8x128xf32>,
      %cst_37 = arith.constant 0.000000e+00 : f32
      %51 = vector.broadcast %cst_37 : f32 to vector<8x128xf32>
      %c0_38 = arith.constant 0 : index
      %c0_39 = arith.constant 0 : index
      %52 = vector.load %arg11[%c0_38, %c0_39] : memref<8x128xf32, #tpu.memory_space<vmem>>, vector<8x128xf32>
      tpu.vector_store %arg11[%c0_38, %c0_39], %51 {strides = array<i32>} : memref<8x128xf32, #tpu.memory_space<vmem>>, vector<8x128xf32>,
      %cst_40 = arith.constant 0.000000e+00 : f32
      %53 = vector.broadcast %cst_40 : f32 to vector<8x8xf32>
      %c0_41 = arith.constant 0 : index
      %c0_42 = arith.constant 0 : index
      %54 = vector.load %arg12[%c0_41, %c0_42] : memref<8x8xf32, #tpu.memory_space<vmem>>, vector<8x8xf32>
      tpu.vector_store %arg12[%c0_41, %c0_42], %53 {strides = array<i32>} : memref<8x8xf32, #tpu.memory_space<vmem>>, vector<8x8xf32>,
    } else {
    }
    %c0_i32_1 = arith.constant 0 : i32
    %3 = arith.cmpi eq, %arg2, %c0_i32_1 : i32
    %c0_i32_2 = arith.constant 0 : i32
    %4 = arith.cmpi eq, %arg3, %c0_i32_2 : i32
    %5 = arith.andi %3, %4 : i1
    %6 = arith.extui %5 : i1 to i32
    %c0_i32_3 = arith.constant 0 : i32
    %7 = arith.cmpi ne, %6, %c0_i32_3 : i32
    scf.if %7 {
      %cst_34 = arith.constant 0.000000e+00 : f32
      %49 = vector.broadcast %cst_34 : f32 to vector<8x32xf32>
      %c0_35 = arith.constant 0 : index
      %c0_36 = arith.constant 0 : index
      %50 = vector.load %arg13[%c0_35, %c0_36] : memref<8x32xf32, #tpu.memory_space<vmem>>, vector<8x32xf32>
      tpu.vector_store %arg13[%c0_35, %c0_36], %49 {strides = array<i32>} : memref<8x32xf32, #tpu.memory_space<vmem>>, vector<8x32xf32>,
    } else {
    }
    %c0 = arith.constant 0 : index
    %c0_4 = arith.constant 0 : index
    %c0_5 = arith.constant 0 : index
    %c0_6 = arith.constant 0 : index
    %8 = vector.load %arg4[%c0, %c0_4, %c0_5, %c0_6] : memref<1x1x8x8xf32, #tpu.memory_space<vmem>>, vector<1x1x8x8xf32>
    %9 = vector.shape_cast %8 : vector<1x1x8x8xf32> to vector<8x8xf32>
    %c0_7 = arith.constant 0 : index
    %c0_8 = arith.constant 0 : index
    %c0_9 = arith.constant 0 : index
    %c0_10 = arith.constant 0 : index
    %10 = vector.load %arg5[%c0_7, %c0_8, %c0_9, %c0_10] : memref<1x1x8x8xf32, #tpu.memory_space<vmem>>, vector<1x1x8x8xf32>
    %11 = vector.shape_cast %10 : vector<1x1x8x8xf32> to vector<8x8xf32>
    %c0_11 = arith.constant 0 : index
    %c0_12 = arith.constant 0 : index
    %c0_13 = arith.constant 0 : index
    %c0_14 = arith.constant 0 : index
    %12 = vector.load %arg6[%c0_11, %c0_12, %c0_13, %c0_14] : memref<1x1x8x8xf32, #tpu.memory_space<vmem>>, vector<1x1x8x8xf32>
    %13 = vector.shape_cast %12 : vector<1x1x8x8xf32> to vector<8x8xf32>
    %cst = arith.constant dense<0.000000e+00> : vector<8x8xf32>
    %14 = tpu.matmul %9, %11, %cst {dimension_numbers = #tpu.dot_dimension_numbers<[1], [1], [0], [0], [0, 0, 1, 0], [], []>} : vector<8x8xf32>, vector<8x8xf32>, vector<8x8xf32> -> vector<8x8xf32>
    %c0_15 = arith.constant 0 : index
    %c0_16 = arith.constant 0 : index
    %15 = vector.load %arg10[%c0_15, %c0_16] : memref<8x128xf32, #tpu.memory_space<vmem>>, vector<8x128xf32>
    %c0_17 = arith.constant 0 : index
    %c0_18 = arith.constant 0 : index
    %16 = vector.load %arg11[%c0_17, %c0_18] : memref<8x128xf32, #tpu.memory_space<vmem>>, vector<8x128xf32>
    %cst_19 = arith.constant dense<0xFF800000> : vector<8xf32>
    %17 = vector.multi_reduction <maximumf>, %14, %cst_19 [1] : vector<8x8xf32> to vector<8xf32>
    %18 = vector.shape_cast %17 : vector<8xf32> to vector<8x1xf32>
    %19 = vector.broadcast %18 : vector<8x1xf32> to vector<8x128xf32>
    %20 = arith.maximumf %15, %19 : vector<8x128xf32>
    %21 = arith.subf %15, %20 : vector<8x128xf32>
    %22 = math.exp %21 : vector<8x128xf32>
    %23 = vector.extract_strided_slice %20 {offsets = [0, 0], sizes = [8, 1], strides = [1, 1]} : vector<8x128xf32> to vector<8x1xf32>
    %24 = vector.broadcast %23 : vector<8x1xf32> to vector<8x8xf32>
    %25 = arith.subf %14, %24 : vector<8x8xf32>
    %26 = math.exp %25 : vector<8x8xf32>
    %27 = arith.mulf %22, %16 : vector<8x128xf32>
    %cst_20 = arith.constant dense<0.000000e+00> : vector<8xf32>
    %28 = vector.multi_reduction <add>, %26, %cst_20 [1] : vector<8x8xf32> to vector<8xf32>
    %29 = vector.shape_cast %28 : vector<8xf32> to vector<8x1xf32>
    %30 = vector.broadcast %29 : vector<8x1xf32> to vector<8x128xf32>
    %31 = arith.addf %27, %30 : vector<8x128xf32>
    %c0_21 = arith.constant 0 : index
    %c0_22 = arith.constant 0 : index
    %32 = vector.load %arg11[%c0_21, %c0_22] : memref<8x128xf32, #tpu.memory_space<vmem>>, vector<8x128xf32>
    tpu.vector_store %arg11[%c0_21, %c0_22], %31 {strides = array<i32>} : memref<8x128xf32, #tpu.memory_space<vmem>>, vector<8x128xf32>,
    %33 = vector.extract_strided_slice %22 {offsets = [0, 0], sizes = [8, 1], strides = [1, 1]} : vector<8x128xf32> to vector<8x1xf32>
    %c0_23 = arith.constant 0 : index
    %c0_24 = arith.constant 0 : index
    %34 = vector.load %arg12[%c0_23, %c0_24] : memref<8x8xf32, #tpu.memory_space<vmem>>, vector<8x8xf32>
    %35 = vector.broadcast %33 : vector<8x1xf32> to vector<8x8xf32>
    %36 = arith.mulf %35, %34 : vector<8x8xf32>
    %cst_25 = arith.constant dense<0.000000e+00> : vector<8x8xf32>
    %37 = tpu.matmul %26, %13, %cst_25 {dimension_numbers = #tpu.dot_dimension_numbers<[1], [0], [0], [1], [0, 0, 1, 1], [], []>} : vector<8x8xf32>, vector<8x8xf32>, vector<8x8xf32> -> vector<8x8xf32>
    %38 = arith.addf %36, %37 : vector<8x8xf32>
    %c0_26 = arith.constant 0 : index
    %c0_27 = arith.constant 0 : index
    %39 = vector.load %arg12[%c0_26, %c0_27] : memref<8x8xf32, #tpu.memory_space<vmem>>, vector<8x8xf32>
    tpu.vector_store %arg12[%c0_26, %c0_27], %38 {strides = array<i32>} : memref<8x8xf32, #tpu.memory_space<vmem>>, vector<8x8xf32>,
    %c0_28 = arith.constant 0 : index
    %c0_29 = arith.constant 0 : index
    %40 = vector.load %arg10[%c0_28, %c0_29] : memref<8x128xf32, #tpu.memory_space<vmem>>, vector<8x128xf32>
    tpu.vector_store %arg10[%c0_28, %c0_29], %20 {strides = array<i32>} : memref<8x128xf32, #tpu.memory_space<vmem>>, vector<8x128xf32>,
    %c0_i32_30 = arith.constant 0 : i32
    %41 = arith.cmpi eq, %arg3, %c0_i32_30 : i32
    %42 = arith.extui %41 : i1 to i32
    %c0_i32_31 = arith.constant 0 : i32
    %43 = arith.cmpi ne, %42, %c0_i32_31 : i32
    scf.if %43 {
      %c0_34 = arith.constant 0 : index
      %c0_35 = arith.constant 0 : index
      %49 = vector.load %arg11[%c0_34, %c0_35] : memref<8x128xf32, #tpu.memory_space<vmem>>, vector<8x128xf32>
      %cst_36 = arith.constant 1.000000e+00 : f32
      %50 = vector.broadcast %cst_36 : f32 to vector<8x128xf32>
      %51 = arith.divf %50, %49 : vector<8x128xf32>
      %c0_37 = arith.constant 0 : index
      %c0_38 = arith.constant 0 : index
      %52 = vector.load %arg12[%c0_37, %c0_38] : memref<8x8xf32, #tpu.memory_space<vmem>>, vector<8x8xf32>
      %53 = vector.extract_strided_slice %51 {offsets = [0, 0], sizes = [8, 1], strides = [1, 1]} : vector<8x128xf32> to vector<8x1xf32>
      %54 = vector.broadcast %53 : vector<8x1xf32> to vector<8x8xf32>
      %55 = arith.mulf %52, %54 : vector<8x8xf32>
      %c0_39 = arith.constant 0 : index
      %c0_40 = arith.constant 0 : index
      %56 = vector.load %arg13[%c0_39, %c0_40] : memref<8x32xf32, #tpu.memory_space<vmem>>, vector<8x32xf32>
      %c0_41 = arith.constant 0 : index
      %c0_42 = arith.constant 0 : index
      %c0_43 = arith.constant 0 : index
      %57 = vector.load %arg7[%c0_41, %c0_42, %c0_43] : memref<1x8x32xf32, #tpu.memory_space<vmem>>, vector<1x8x32xf32>
      %58 = vector.shape_cast %57 : vector<1x8x32xf32> to vector<8x32xf32>
      %cst_44 = arith.constant dense<0.000000e+00> : vector<8x32xf32>
      %59 = tpu.matmul %55, %58, %cst_44 {dimension_numbers = #tpu.dot_dimension_numbers<[1], [0], [0], [1], [0, 0, 1, 1], [], []>} : vector<8x8xf32>, vector<8x32xf32>, vector<8x32xf32> -> vector<8x32xf32>
      %60 = arith.addf %56, %59 : vector<8x32xf32>
      %c0_45 = arith.constant 0 : index
      %c0_46 = arith.constant 0 : index
      %61 = vector.load %arg13[%c0_45, %c0_46] : memref<8x32xf32, #tpu.memory_space<vmem>>, vector<8x32xf32>
      tpu.vector_store %arg13[%c0_45, %c0_46], %60 {strides = array<i32>} : memref<8x32xf32, #tpu.memory_space<vmem>>, vector<8x32xf32>,
    } else {
    }
    %c0_i32_32 = arith.constant 0 : i32
    %44 = arith.cmpi eq, %arg3, %c0_i32_32 : i32
    %c3_i32 = arith.constant 3 : i32
    %45 = arith.cmpi eq, %arg2, %c3_i32 : i32
    %46 = arith.andi %44, %45 : i1
    %47 = arith.extui %46 : i1 to i32
    %c0_i32_33 = arith.constant 0 : i32
    %48 = arith.cmpi ne, %47, %c0_i32_33 : i32
    scf.if %48 {
      %c0_34 = arith.constant 0 : index
      %c0_35 = arith.constant 0 : index
      %49 = vector.load %arg13[%c0_34, %c0_35] : memref<8x32xf32, #tpu.memory_space<vmem>>, vector<8x32xf32>
      %c0_36 = arith.constant 0 : index
      %c0_37 = arith.constant 0 : index
      %50 = vector.load %arg8[%c0_36, %c0_37] : memref<1x32xf32, #tpu.memory_space<vmem>>, vector<1x32xf32>
      %51 = vector.broadcast %50 : vector<1x32xf32> to vector<8x32xf32>
      %52 = arith.addf %49, %51 : vector<8x32xf32>
      %c0_38 = arith.constant 0 : index
      %c0_39 = arith.constant 0 : index
      %c0_40 = arith.constant 0 : index
      %53 = vector.load %arg9[%c0_38, %c0_39, %c0_40] : memref<1x8x32xf32, #tpu.memory_space<vmem>>, vector<1x8x32xf32>
      %54 = vector.shape_cast %53 : vector<1x8x32xf32> to vector<8x32xf32>
      %55 = vector.shape_cast %52 : vector<8x32xf32> to vector<1x8x32xf32>
      tpu.vector_store %arg9[%c0_38, %c0_39, %c0_40], %55 {strides = array<i32>} : memref<1x8x32xf32, #tpu.memory_space<vmem>>, vector<1x8x32xf32>,
    } else {
    }
    return
  }
  func.func @transform_0(%arg0: i32, %arg1: i32, %arg2: i32, %arg3: i32) -> (i32, i32, i32, i32) {
    %c0_i32 = arith.constant 0 : i32
    %c0_i32_0 = arith.constant 0 : i32
    return %arg0, %arg2, %arg1, %c0_i32 : i32, i32, i32, i32
  }
  func.func @transform_1(%arg0: i32, %arg1: i32, %arg2: i32, %arg3: i32) -> (i32, i32, i32, i32) {
    %c0_i32 = arith.constant 0 : i32
    %c0_i32_0 = arith.constant 0 : i32
    return %arg0, %arg2, %arg3, %c0_i32 : i32, i32, i32, i32
  }
  func.func @transform_2(%arg0: i32, %arg1: i32, %arg2: i32, %arg3: i32) -> (i32, i32, i32, i32) {
    %c0_i32 = arith.constant 0 : i32
    %c0_i32_0 = arith.constant 0 : i32
    return %arg0, %arg2, %arg3, %c0_i32 : i32, i32, i32, i32
  }
  func.func @transform_3(%arg0: i32, %arg1: i32, %arg2: i32, %arg3: i32) -> (i32, i32, i32) {
    %c0_i32 = arith.constant 0 : i32
    %c0_i32_0 = arith.constant 0 : i32
    %c0_i32_1 = arith.constant 0 : i32
    return %arg2, %c0_i32, %c0_i32_0 : i32, i32, i32
  }
  func.func @transform_4(%arg0: i32, %arg1: i32, %arg2: i32, %arg3: i32) -> (i32, i32) {
    %c0_i32 = arith.constant 0 : i32
    %c0_i32_0 = arith.constant 0 : i32
    %c0_i32_1 = arith.constant 0 : i32
    return %c0_i32, %c0_i32_0 : i32, i32
  }
  func.func @transform_5(%arg0: i32, %arg1: i32, %arg2: i32, %arg3: i32) -> (i32, i32, i32) {
    %c0_i32 = arith.constant 0 : i32
    %c0_i32_0 = arith.constant 0 : i32
    return %arg0, %arg1, %c0_i32 : i32, i32, i32
  }
}

</mosaic_0001>

<bundles_post_ra>
// kernel: self_attention.3
= control target key start
LH: loop header
LB: loop body
LE: loop exit
PB: predicated region body
PF: predicated region fallthrough
CT: control target
= control target key end

     0   :  { %10 = vsyncpa [#allocation7], 0  ;;  %s1272_s0 = inlined_call_operand.vmem [shape: f32[2,4,8,8], index: 0, kind: input, shape index: {}]   ;;  %s1273_s1 = inlined_call_operand.vmem [shape: f32[2,4,8,8], index: 1, kind: input, shape index: {}]   ;;  %s1274_s2 = inlined_call_operand.vmem [shape: f32[2,4,8,8], index: 2, kind: input, shape index: {}]   ;;  %s1275_s3 = inlined_call_operand.vmem [shape: f32[4,8,32], index: 3, kind: input, shape index: {}]   ;;  %s1276_s4 = inlined_call_operand.vmem [shape: f32[1,32], index: 4, kind: input, shape index: {}]   ;;  %s1277_s5 = inlined_call_operand.hbm [shape: f32[2,8,32], index: 5, kind: output, shape index: {}]  }
   0x1   :  { %12 = vsyncpa [#allocation7 + $0x1], 0  ;;  %s1100_s18 = smov 0   ;;  %s1102_s19 = smov 0  }
   0x2   :  { %s1104_s20 = smov 0   ;;  %s1106_s21 = smov 0  }
   0x3   :  { %s1108_s22 = smov 0   ;;  %s1110_s23 = smov 0  }
   0x4   :  { %s1112_s24 = smov 0   ;;  %s1114_s25 = smov 0  }
   0x5 LB: > { %1282 = sst [smem:[#allocation9_spill]] %s1054_s23  ;;  %s837_s26 = sadd.s32 4294967295, %s1062_s25   ;;  %s1062_s25 = sphi %s1114_s25, %s18_s25   ;;  %s1058_s24 = sphi %s1112_s24, %s1292_s24   ;;  %s1054_s23 = sphi %s1110_s23, %s1291_s23   ;;  %s1050_s22 = sphi %s1108_s22, %s1290_s22   ;;  %s1046_s21 = sphi %s1106_s21, %s1289_s21   ;;  %s1042_s20 = sphi %s1104_s20, %s1295_s20   ;;  %s1038_s19 = sphi %s1102_s19, %s1294_s19   ;;  %s1034_s18 = sphi %s1100_s18, %s1293_s18  }
   0x6   : > { %1283 = sst [smem:[#allocation10_spill]] %s1058_s24  ;;  %s838_s27 = sadd.s32 4294967294, %s1062_s25  }
   0x7   : > { %s36_s28 = sadd.s32 1, %s1054_s23  ;;  %s44_s29 = sadd.s32 1, %s1058_s24 }
   0x8   : > { %p38_p0 = scmp.ge.s32.totalorder %s36_s28, 4  ;;  %p200_p1 = scmp.ne.s32.totalorder %s1042_s20, %s1038_s19 }
   0x9   : > { %p201_p2 = scmp.eq.s32.totalorder %s837_s26, 7  ;;  %p206_p4 = scmp.ne.s32.totalorder %s1038_s19, %s1034_s18 }
   0xa   : > { %s1297_s28 = smov (%p38_p0, %s36_s28), 0  ;;  %s1299_s29 = smov (!%p38_p0, %s44_s29), %s1058_s24 }
   0xb   : > { %1284 = sst [smem:[#allocation11_spill]] %s1297_s28  ;;  %p1149_p3 = por %p201_p2, %p200_p1 }
   0xc   : > { %p46_p5 = scmp.ge.s32.totalorder %s1299_s29, 2  ;;  %p207_p6 = scmp.eq.s32.totalorder %s838_s27, 7 }
   0xd   : > { %p841_p7 = scmp.ge.s32.totalorder %s1062_s25, 1  ;;  %p277_p8 = scmp.lt.s32.totalorder %s1062_s25, 9 }
   0xe   : > { %s1301_s29 = smov (%p46_p5, %s1299_s29), 0  ;;  %p1159_p9 = por %p207_p6, %p206_p4 }
   0xf   : > { %1286 = sst [smem:[#allocation12_spill]] %s1301_s29  ;;  %p278_p10 = pnand %p841_p7, %p277_p8 }
  0x10   : > { %s185_s7 = ssub.s32 %s1058_s24, %s1301_s29  ;;  %s190_s8 = sadd.s32 1, %s1042_s20  ;;  %vm380_vm0 = vcmask (!%p278_p10), 64512   ;;  %v1064_v0 = vmov (!%p278_p10), -inf   ;;  %v1065_v1 = vmov (!%p278_p10), 0.0  }
  0x11   : > { %p188_p11 = scmp.eq.s32.totalorder %s185_s7, 0  ;;  %281 = sbr.rel (%p278_p10) target bundleno = 1073 (0x431), region = 40  ;;  %378 = vst [vmem:[#allocation2] sm:$0xff] (!%p278_p10), %v1064_v0  ;;  %379 = vst [vmem:[#allocation3] sm:$0xff] (!%p278_p10), %v1065_v1 }
  0x12   : > { %s1278_s10 = sand.u32 (!%p278_p10), 1, %s1038_s19   ;;  %p337_p12 = scmp.lt.s32.totalorder (!%p278_p10), %s1050_s22, 1  ;;  %381 = vst.msk [vmem:[#allocation4] sm:$0xff] (!%p278_p10), %vm380_vm0, %v1065_v1 }
  0x13   : > { %s1167_s9 = scalar_select %p188_p11, %s1042_s20, %s190_s8  }
  0x14   : > { %s1173_s11 = sshll.u32 (!%p278_p10), %s1278_s10, 3  ;;  %p339_p13 = scmp.lt.s32.totalorder (!%p278_p10), %s1046_s21, 3 }
  0x15   : > { %p382_p0 = scmp.eq.s32.totalorder (!%p278_p10), %s1046_s21, 0  ;;  %s336_s23 = scalar_lea.vmem (!%p278_p10), [#allocation6], %s1173_s11 }
  0x18   : > { %s338_s12 = scalar_select %p337_p12, %s1050_s22, 1 }
  0x19   : > { %s340_s13 = scalar_select %p339_p13, %s1046_s21, 3 }
  0x1a   : > { %s843_s14 = sshll.u32 %s338_s12, 2  ;;  %386 = sbr.rel (!%p382_p0) target bundleno = 33 (0x21), region = 48  ;;  %vm387_vm1 = vcmask (%p382_p0), 261120   ;;  %v1066_v2 = vmov (%p382_p0), 0.0  }
  0x1b   : > { %s345_s15 = sadd.s32 %s843_s14, %s340_s13  ;;  %s849_s16 = sshll.u32 %s340_s13, 3  ;;  %388 = vst.msk [vmem:[#allocation5] sm:$0xff] (%p382_p0), %vm387_vm1, %v1066_v2 }
  0x1c   : > { %s1180_s17 = sshll.u32 %s345_s15, 3  ;;  %s1185_s7 = scalar_lea.vmem %s1275_s3, %s849_s16 }
  0x1d   : > { %s347_s29 = scalar_lea.vmem %s1272_s0, %s1180_s17  ;;  %s358_s12 = scalar_lea.vmem %s1273_s1, %s1180_s17 }
  0x1e   : > { %s369_s15 = scalar_lea.vmem %s1274_s2, %s1180_s17 }
  0x21 PF: > { %869 = vmatprep.subr.mxu0 %v1065_v1  ;;  %v390_v3 = vld [vmem:[%s358_s12] sm:$0xff]  ;;  %874 = vmatprep.subr.mxu1 %v1065_v1  ;;  %vm1067_vm2 = vmmov 0   ;;  %v1068_v8 = vmov 0   ;;  %v470_v22 = vld [vmem:[#allocation3] sm:$0xff]  ;;  %v492_v27 = vld [vmem:[#allocation4] sm:$0xff]  ;;  %p666_p1 = scmp.eq.s32.totalorder %s1046_s21, 3 }
  0x22   : > { %870 = vmatpush3.xpose.msk.msra.mxu0 %vm380_vm0, %v390_v3  ;;  %871 = vmatprep.mubr.msk.f32.mxu0 %vm1067_vm2, %v1065_v1  ;;  %v389_v4 = vld [vmem:[%s347_s29] sm:$0xff]  ;;  %v588_v36 = vld [vmem:[#allocation5] sm:$0xff]  ;;  %vm664_vm3 = vcmask 261120  }
  0x23   : > { %876 = vmatprep.mubr.msk.f32.mxu1 %vm1067_vm2, %v1065_v1  ;;  %960 = vset.pattern.permute.xlu0 %v1068_v8  ;;  %v469_v9 = vld [vmem:[#allocation2] sm:$0xff] }
  0x24   : > { %961 = vset.pattern.permute.xlu1 %v1068_v8  ;;  %v391_v13 = vld [vmem:[%s369_s15] sm:$0xff] }
  0x25   : > { %872 = vmatmul.mubr.msk.f32.vlgmr.msra.gmra.mrb[0].mxu0 %vm380_vm0, %v389_v4  ;;  %875 = vmatpush3.msra.mxu1 %v391_v13  ;;  %v589_v21 = vld [vmem:[%s1185_s7] sm:$0xff] }
  0x26   : > { %879 = vmatprep.subr.mxu1 %v1065_v1  ;;  %v856_v41 = vld [vmem:[%s1276_s4] ss:$0 sm:$0xff] (%p666_p1) }
  0xf8   : > { %v465_v5 = vpop.f32.mrb[0].mxu0 }
  0xf9   : > { %v873_v6 = vpop.f32.mrb[1].mxu0  ;;  %v471_v7 = vsel %vm380_vm0, %v465_v5, -inf }
  0xfa   : > { %472 = vmax.xlane.f32.xlu0 %v471_v7 }
 0x187   : > { %v473_v10 = vpop.xlane.xlu0 %472 }
 0x188   : > { %v474_v11 = vmax.f32 %v469_v9, %v473_v10 }
 0x18a   : > { %v475_v12 = vsub.f32 %v469_v9, %v474_v11  ;;  %574 = vst [vmem:[#allocation2] sm:$0xff] %v474_v11  ;;  %480 = vperm.xlu0 %960, %v474_v11  }
 0x18c   : > { %v476_v19 = vmul.f32 1.442695, %v475_v12 }
 0x209   : > { %v481_v14 = vpop.permute.xlu0 %480 }
 0x20a   : > { %v483_v15 = vsub.f32 %v465_v5, %v481_v14 }
 0x20c   : > { %v484_v16 = vmul.f32 1.442695, %v483_v15 }
 0x20e   : > { %962 = vpow2.f32 %v484_v16 }
 0x20f   : > { %964 = vpow2.f32 %v476_v19 }
 0x218   : > { %v963_v17 = vpop.eup %962 }
 0x219   : > { %877 = vmatmul.mubr.msk.f32.vlgmr.msra.gmra.mrb[0].mxu1 %vm380_vm0, %v963_v17  ;;  %v487_v18 = vsel %vm380_vm0, %v963_v17, 0.0  ;;  %v965_v20 = vpop.eup %964 }
 0x21a   : > { %488 = vadd.xlane.f32.xlu1 %v487_v18  ;;  %881 = vmatprep.mubr.msk.f32.mxu1 %vm1067_vm2, %v1065_v1  ;;  %v486_v23 = vmul.f32 %v965_v20, %v470_v22 }
 0x21b   : > { %880 = vmatpush3.msra.mxu1 %v589_v21 }
 0x22b   : > { %495 = vperm.xlu1 %961, %v965_v20  }
 0x2a7   : > { %v489_v24 = vpop.xlane.xlu1 %488 }
 0x2a8   : > { %v490_v25 = vadd.f32 %v489_v24, %v486_v23 }
 0x2aa   : > { %491 = vst [vmem:[#allocation3] sm:$0xff] %v490_v25  ;;  %966 = vrcp.f32 %v490_v25 }
 0x2ab   : > { %v496_v28 = vpop.permute.xlu1 %495 }
 0x2ac   : > { %v498_v29 = vmul.f32 %v496_v28, %v492_v27 }
 0x2b4   : > { %v967_v26 = vpop.eup %966 }
 0x2b5   : > { %584 = vperm.xlu1 %961, %v967_v26  }
 0x2ec   : > { %v568_v30 = vpop.f32.mrb[0].mxu1 }
 0x2ed   : > { %v572_v31 = vadd.f32 %v568_v30, %v498_v29  ;;  %v878_v32 = vpop.f32.mrb[1].mxu1 }
 0x2ef   : > { %573 = vst.msk [vmem:[#allocation4] sm:$0xff] %vm380_vm0, %v572_v31 }
 0x2f6   : > { %v581_v33 = vld [vmem:[#allocation4] sm:$0xff] }
 0x334   : > { %v585_v34 = vpop.permute.xlu1 %584 }
 0x335   : > { %v587_v35 = vmul.f32 %v585_v34, %v581_v33 }
 0x337   : > { %882 = vmatmul.mubr.msk.f32.vlgmr.msra.gmra.mrb[2].mxu1 %vm380_vm0, %v587_v35 }
 0x407   : > { %670 = sbr.rel (!%p666_p1) target bundleno = 1048 (0x418), region = 56 }
 0x40a   : > { %v659_v37 = vpop.f32.mrb[2].mxu1 }
 0x40b   : > { %v663_v38 = vadd.f32 %v659_v37, %v588_v36  ;;  %v883_v39 = vpop.f32.mrb[3].mxu1 }
 0x40d   : > { %665 = vst.msk [vmem:[#allocation5] sm:$0xff] %vm664_vm3, %v663_v38 }
 0x414   : > { %v671_v40 = vld [vmem:[#allocation5] sm:$0xff] }
 0x415   : > { %v679_v42 = vadd.f32 %v856_v41, %v671_v40 }
 0x417   : > { %681 = vst.msk [vmem:[%s336_s23] sm:$0xff] %vm664_vm3, %v679_v42 }
 0x418 PF: > { %s858_s21 = sshll.u32 %s1050_s22, 7  ;;  %s697_s17 = sshll.u32 %s336_s23, 4  ;;  %s698_s17 = int_to_ptr.vmem [resolvable:$true] %s697_s17 }
 0x419   : > { %s1221_s16 = scalar_lea.hbm %s1277_s5, %s858_s21  ;;  %s1288_s26 = sand.u32 1, %s1038_s19  }
 0x41a   : > { %s683_s27 = scalar_lea.sflag [#allocation7], %s1288_s26  ;;  %s968_s7 = scalar_lea.vmem %s698_s17, 128 }
 0x41b   : > { %p969_p2 = scmp.ne.s32.totalorder %s698_s17, %s968_s7  ;;  %s1069_s8 = smov [#allocation6]  }
 0x41c   : > { %s972_s12 = sshll.u32 %s1069_s8, 4  ;;  %s973_s12 = int_to_ptr.vmem [resolvable:$false] %s972_s12 }
 0x41d   : > { %p970_p4 = pnand %p969_p2, %p1149_p3  ;;  %s974_s14 = scalar_lea.vmem %s973_s12, 256 }
 0x41e   : > { %p975_p6 = scmp.lt.s32.totalorder %s698_s17, %s973_s12  ;;  %p976_p7 = scmp.lt.s32.totalorder %s974_s14, %s968_s7 }
 0x41f   : > { %p971_p5 = pneg %p970_p4 }
 0x420   : > { %p977_p8 = por %p976_p7, %p975_p6 }
 0x422   : > { %p978_p10 = pnand %p977_p8, %p971_p5 }
 0x424   : > { %981 = shalt.err (!%p978_p10)
}
 0x425   : > { %s982_s22 = scalar_lea.hbm %s1221_s16, 128  ;;  %s986_s13 = scalar_lea.hbm %s1277_s5, 256 }
 0x426   : > { %p983_p11 = scmp.ne.s32.totalorder %s1221_s16, %s982_s22  ;;  %p987_p0 = scmp.lt.u32.totalorder %s1221_s16, %s1277_s5 }
 0x427   : > { %p988_p1 = scmp.lt.u32.totalorder %s986_s13, %s982_s22  ;;  %p990_p4 = scmp.lt.u32.totalorder %s982_s22, %s1221_s16 }
 0x428   : > { %p984_p12 = pnand %p983_p11, %p1149_p3 }
 0x429   : > { %p989_p2 = por %p988_p1, %p987_p0 }
 0x42a   : > { %p985_p13 = pneg %p984_p12 }
 0x42b   : > { %p991_p5 = por %p990_p4, %p989_p2 }
 0x42d   : > { %p992_p6 = pnand %p991_p5, %p985_p13 }
 0x42f   : > { %995 = shalt.err (!%p992_p6)
}
 0x430   : > { %884 = dma.vmem_to_hbm [thread:$0]  (%p1149_p3), %s698_s17, 128, %s1221_s16, %s683_s27  }
 0x431 PF: > { %p890_p7 = scmp.ge.s32.totalorder %s1062_s25, 2  ;;  %s709_s28 = sand.u32 1, %s1034_s18  }
 0x432   : > { %s710_s21 = scalar_lea.sflag [#allocation7], %s709_s28 }
 0x433   : > { %p887_p8 = pnand %p890_p7, %p1159_p9 }
 0x435   : > { %1029 = dma.done.wait (!%p887_p8), %s710_s21, 128  }
 0x436   : > { %1031 = vsyncadd (!%p887_p8), %s710_s21, 4294967168  ;;  %s18_s25 = sadd.s32 1, %s1062_s25   ;;  %s1289_s21 = sld [smem:[#allocation9_spill]] }
 0x437   : > { %p15_p10 = scmp.ge.s32.totalorder %s18_s25, 10   ;;  %s1290_s22 = sld [smem:[#allocation10_spill]] }
 0x438   : > { %s1291_s23 = sld [smem:[#allocation11_spill]]  ;;  %s1292_s24 = sld [smem:[#allocation12_spill]] }
 0x439   : > { %s1293_s18 = smov %s1038_s19  ;;  %s1294_s19 = smov %s1042_s20 }
 0x43a   : > { %s1295_s20 = smov %s1167_s9  ;;  %17 = sbr.rel (!%p15_p10) target bundleno = 5 (0x5), region = 100 }
 0x441   :  { %715 = vsyncpa [#allocation7], 1 }
 0x442   :  { %717 = vsyncpa [#allocation7 + $0x1], 1 }

// kernel: self_attention.2
= control target key start
LH: loop header
LB: loop body
LE: loop exit
PB: predicated region body
PF: predicated region fallthrough
CT: control target
= control target key end

     0   :  { %s1292_s30 = smov 0   ;;  %s1294_s10 = smov 0   ;;  %s1381_s0 = inlined_call_operand.vmem [shape: f32[2,8,32], index: 0, kind: input, shape index: {}]   ;;  %s1382_s1 = inlined_call_operand.vmem [shape: f32[4,32,8], index: 1, kind: input, shape index: {}]   ;;  %s1383_s2 = inlined_call_operand.vmem [shape: f32[4,32,8], index: 2, kind: input, shape index: {}]   ;;  %s1384_s3 = inlined_call_operand.vmem [shape: f32[4,32,8], index: 3, kind: input, shape index: {}]   ;;  %s1385_s4 = inlined_call_operand.vmem [shape: f32[4,1,8], index: 4, kind: input, shape index: {}]   ;;  %s1386_s5 = inlined_call_operand.vmem [shape: f32[4,1,8], index: 5, kind: input, shape index: {}]   ;;  %s1387_s6 = inlined_call_operand.vmem [shape: f32[4,1,8], index: 6, kind: input, shape index: {}]   ;;  %s1388_s7 = inlined_call_operand.vmem [shape: f32[2,4,8,8], index: 7, kind: output, shape index: {0}]   ;;  %s1389_s8 = inlined_call_operand.vmem [shape: f32[2,4,8,8], index: 8, kind: output, shape index: {1}]   ;;  %s1390_s9 = inlined_call_operand.vmem [shape: f32[2,4,8,8], index: 9, kind: output, shape index: {2}]  }
   0x1   :  { %s1296_s11 = smov 0   ;;  %s1298_s12 = smov 0  }
   0x2   :  { %s1300_s13 = smov 0  }
   0x3 LB: > { %s32_s14 = sadd.s32 1, %s1229_s11  ;;  %s39_s15 = sadd.s32 1, %s1233_s12  ;;  %s1237_s13 = sphi %s1300_s13, %s20_s13   ;;  %s1233_s12 = sphi %s1298_s12, %s1394_s12   ;;  %s1229_s11 = sphi %s1296_s11, %s1393_s11   ;;  %s1225_s10 = sphi %s1294_s10, %s1392_s10   ;;  %s1221_s30 = sphi %s1292_s30, %s1391_s30  }
   0x4   : > { %p33_p0 = scmp.ge.s32.totalorder %s32_s14, 4  ;;  %p1065_p1 = scmp.ge.s32.totalorder %s1237_s13, 1 }
   0x5   : > { %p381_p2 = scmp.lt.s32.totalorder %s1237_s13, 9 }
   0x6   : > { %s1396_s14 = smov (%p33_p0, %s32_s14), 0  ;;  %s1398_s15 = smov (!%p33_p0, %s39_s15), %s1233_s12 }
   0x7   : > { %p382_p3 = pnand %p1065_p1, %p381_p2  ;;  %p41_p4 = scmp.ge.s32.totalorder %s1398_s15, 2 }
   0x8   : > { %p478_p5 = scmp.lt.s32.totalorder (!%p382_p3), %s1221_s30, 3  ;;  %p471_p6 = scmp.lt.s32.totalorder (!%p382_p3), %s1225_s10, 1  ;;  %v1239_v0 = vmov (!%p382_p3), 0.0|0.0   ;;  %vm1240_vm0 = vmmov (!%p382_p3), 0   ;;  %v1241_v1 = vmov (!%p382_p3), 0.0   ;;  %vm547_vm1 = vcmask (!%p382_p3), 261120  }
   0x9   : > { %s1400_s15 = smov (%p41_p4, %s1398_s15), 0  ;;  %385 = sbr.rel (%p382_p3) target bundleno = 252 (0xfc), region = 48 }
   0xa   : > { %1138 = vmatprep.subr.bf16.mxu0 (!%p382_p3), %v1239_v0  ;;  %1113 = vmatprep.mubr.msk.f32.mxu0 (!%p382_p3), %vm1240_vm0, %v1241_v1  ;;  %vm622_vm2 = vcmask (!%p382_p3), 64512  }
   0xb   : > { %1144 = vmatprep.subr.bf16.mxu1 (!%p382_p3), %v1239_v0  ;;  %1124 = vmatprep.mubr.msk.f32.mxu1 (!%p382_p3), %vm1240_vm0, %v1241_v1 }
  0x10   : > { %s1402_s30 = smov (!%p478_p5, %s1221_s30), 3  ;;  %s1404_s10 = smov (!%p471_p6, %s1225_s10), 1 }
  0x11   : > { %s1087_s16 = sshll.u32 %s1402_s30, 5  ;;  %s1066_s23 = sshll.u32 %s1404_s10, 3 }
  0x12   : > { %s482_s19 = scalar_lea.vmem %s1382_s1, %s1087_s16  ;;  %s492_s22 = scalar_lea.vmem %s1384_s3, %s1087_s16 }
  0x13   : > { %v536_v2 = vld [vmem:[%s482_s19] sm:$0xff]  ;;  %v537_v3 = vld [vmem:[%s482_s19 + $0x8] sm:$0xff]  ;;  %v538_v4 = vld [vmem:[%s482_s19 + $0x10] sm:$0xff]  ;;  %s487_s26 = scalar_lea.vmem %s1383_s2, %s1087_s16  ;;  %s477_s29 = scalar_lea.vmem %s1381_s0, %s1066_s23 }
  0x14   : > { %v1139_v5 = vpack.c.bf16 %v537_v3, %v536_v2  ;;  %v539_v6 = vld [vmem:[%s482_s19 + $0x18] sm:$0xff]  ;;  %v624_v8 = vld [vmem:[%s487_s26] sm:$0xff]  ;;  %v625_v9 = vld [vmem:[%s487_s26 + $0x8] sm:$0xff]  ;;  %s1073_s16 = sshll.u32 %s1404_s10, 2  ;;  %s495_s19 = scalar_lea.vmem %s1385_s4, %s1402_s30 }
  0x15   : > { %v1142_v7 = vpack.c.bf16 %v539_v6, %v538_v4  ;;  %v626_v10 = vld [vmem:[%s487_s26 + $0x10] sm:$0xff]  ;;  %v1145_v11 = vpack.c.bf16 %v625_v9, %v624_v8  ;;  %v706_v12 = vld [vmem:[%s492_s22] sm:$0xff]  ;;  %v707_v13 = vld [vmem:[%s492_s22 + $0x8] sm:$0xff]  ;;  %s510_s20 = sadd.s32 %s1073_s16, %s1402_s30  ;;  %s498_s23 = scalar_lea.vmem %s1386_s5, %s1402_s30 }
  0x16   : > { %1140 = vmatpush3.bf16.msra.mxu0 %v1139_v5  ;;  %v627_v14 = vld [vmem:[%s487_s26 + $0x18] sm:$0xff]  ;;  %v535_v16 = vld [vmem:[%s477_s29] sm:$0xff]  ;;  %v1151_v17 = vpack.c.bf16 %v707_v13, %v706_v12  ;;  %v708_v18 = vld [vmem:[%s492_s22 + $0x10] sm:$0xff]  ;;  %s1074_s24 = sshll.u32 %s510_s20, 3  ;;  %s501_s18 = scalar_lea.vmem %s1387_s6, %s1402_s30 }
  0x17   : > { %1141 = vmatprep.subr.bf16.mxu0 %v1239_v0  ;;  %1146 = vmatpush3.bf16.msra.mxu1 %v1145_v11  ;;  %v1148_v15 = vpack.c.bf16 %v627_v14, %v626_v10  ;;  %v709_v19 = vld [vmem:[%s492_s22 + $0x18] sm:$0xff]  ;;  %v1079_v21 = vld [vmem:[%s495_s19] ss:$0 sm:$0xff]  ;;  %s512_s27 = scalar_lea.vmem %s1388_s7, %s1074_s24  ;;  %s523_s29 = scalar_lea.vmem %s1389_s8, %s1074_s24 }
  0x18   : > { %1147 = vmatprep.subr.bf16.mxu1 %v1239_v0  ;;  %v1154_v20 = vpack.c.bf16 %v709_v19, %v708_v18  ;;  %v1081_v25 = vld [vmem:[%s498_s23] ss:$0 sm:$0xff]  ;;  %s534_s21 = scalar_lea.vmem %s1390_s9, %s1074_s24 }
  0x19   : > { %v1083_v30 = vld [vmem:[%s501_s18] ss:$0 sm:$0xff] }
  0x1a   : > { %1143 = vmatpush3.bf16.msra.mxu0 %v1142_v7 }
  0x1b   : > { %1150 = vmatprep.subr.bf16.mxu0 %v1239_v0  ;;  %1149 = vmatpush3.bf16.msra.mxu1 %v1148_v15 }
  0x1d   : > { %1114 = vmatmul.mubr.msk.f32.vlgmr.msra.gmra.mrb[0].mxu0 %vm547_vm1, %v535_v16 }
  0x1e   : > { %1152 = vmatpush3.bf16.msra.mxu0 %v1151_v17  ;;  %1135 = vmatprep.mubr.msk.f32.mxu0 %vm1240_vm0, %v1241_v1 }
  0x1f   : > { %1153 = vmatprep.subr.bf16.mxu0 %v1239_v0  ;;  %1125 = vmatmul.mubr.msk.f32.vlgmr.msra.gmra.mrb[0].mxu1 %vm547_vm1, %v535_v16 }
  0x22   : > { %1155 = vmatpush3.bf16.msra.mxu0 %v1154_v20 }
  0x25   : > { %1136 = vmatmul.mubr.msk.f32.vlgmr.msra.gmra.mrb[2].mxu0 %vm547_vm1, %v535_v16 }
  0xf0   : > { %v617_v22 = vpop.f32.mrb[0].mxu0 }
  0xf1   : > { %v618_v23 = vadd.f32 %v1079_v21, %v617_v22  ;;  %v1115_v24 = vpop.f32.mrb[1].mxu0 }
  0xf2   : > { %v701_v27 = vpop.f32.mrb[0].mxu1 }
  0xf3   : > { %v621_v26 = vmul.f32 0.35355338, %v618_v23  ;;  %v702_v28 = vadd.f32 %v1081_v25, %v701_v27  ;;  %v1126_v29 = vpop.f32.mrb[1].mxu1 }
  0xf5   : > { %623 = vst.msk [vmem:[%s512_s27] sm:$0xff] %vm622_vm2, %v621_v26  ;;  %705 = vst.msk [vmem:[%s523_s29] sm:$0xff] %vm622_vm2, %v702_v28 }
  0xf8   : > { %v783_v31 = vpop.f32.mrb[2].mxu0 }
  0xf9   : > { %v784_v32 = vadd.f32 %v1083_v30, %v783_v31  ;;  %v1137_v33 = vpop.f32.mrb[3].mxu0 }
  0xfb   : > { %787 = vst.msk [vmem:[%s534_s21] sm:$0xff] %vm622_vm2, %v784_v32 }
  0xfc PF: > { %s20_s13 = sadd.s32 1, %s1237_s13   ;;  %s1391_s30 = smov %s1229_s11 }
  0xfd   : > { %p17_p7 = scmp.ge.s32.totalorder %s20_s13, 10   ;;  %s1392_s10 = smov %s1233_s12 }
  0xfe   : > { %s1393_s11 = smov %s1396_s14  ;;  %s1394_s12 = smov %s1400_s15 }
  0xff   :  { %19 = sbr.rel (!%p17_p7) target bundleno = 3 (0x3), region = 120 }

</bundles_post_ra>
